<compile_context>
chip_gen: v6e
topology: v6e:2x2x1
jax: 0.10.0
libtpu: 0.0.40
codegen_flags: <defaults>
</compile_context>

<pallas_src>
import jax
import jax.numpy as jnp
from jax import lax
from jax.experimental import pallas as pl
from jax.experimental.pallas import tpu as pltpu


def _gsa_kernel(feats_ref, pts_ref, w1f_ref, w1p_ref, b1_ref, w2_ref, b2_ref, o_ref):
    """One (batch_tile, points_tile) block of the GSA forward.

    feats_ref: (TB, D, TN)  features, NCW layout (points on lanes)
    pts_ref  : (TB, P, TN)  xyz coordinates, NCW layout
    w1f_ref  : (D, H1)      layer-1 weight rows acting on feats channels (BN folded)
    w1p_ref  : (P, H1)      layer-1 weight rows acting on point channels (BN folded)
    b1_ref   : (1, H1)      layer-1 folded bias
    w2_ref   : (H1, H2)     layer-2 weight (BN folded)
    b2_ref   : (1, H2)      layer-2 folded bias
    o_ref    : (TB, 1, H2)  running global-max feature (resident across the TN axis)
    """
    is_first = pl.program_id(1) == 0
    tb = feats_ref.shape[0]

    for b in range(tb):  # static unroll over the batch tile
        xf = feats_ref[b].astype(jnp.bfloat16)  # (D, TN)
        xp = pts_ref[b].astype(jnp.bfloat16)    # (P, TN)

        # Layer 1: conv1x1 == channel contraction (transposed-LHS matmul on the MXU),
        # split over feats / points channels so no concat is needed anywhere.
        h1 = lax.dot_general(xf, w1f_ref[...], (((0,), (0,)), ((), ())),
                             preferred_element_type=jnp.float32)          # (TN, H1)
        h1 = h1 + lax.dot_general(xp, w1p_ref[...], (((0,), (0,)), ((), ())),
                                  preferred_element_type=jnp.float32)
        h1 = jnp.maximum(h1 + b1_ref[...], 0.0)

        # Layer 2: conv1x1 -> folded bias -> ReLU.
        h2 = jnp.dot(h1.astype(jnp.bfloat16), w2_ref[...],
                     preferred_element_type=jnp.float32)                  # (TN, H2)
        h2 = jnp.maximum(h2 + b2_ref[...], 0.0)

        # Max over this points tile, then fold into the running max held in o_ref.
        m = jnp.max(h2, axis=0, keepdims=True)                            # (1, H2)

        @pl.when(is_first)
        def _():
            o_ref[b] = m

        @pl.when(jnp.logical_not(is_first))
        def _():
            o_ref[b] = jnp.maximum(o_ref[b], m)


def gsa_conv(points, feats, params, *, batch_tile=1, n_tile=None):
    """GSAConv forward.

    points: (B, P, N) float32 (PyTorch NCW, P=3)
    feats : (B, D, N) float32 (PyTorch NCW)
    params: dict with w1f (D,H1), w1p (P,H1), b1 (1,H1), w2 (H1,H2), b2 (1,H2)
            (conv bias + eval-mode BatchNorm already folded in)
    returns (B, H2) float32
    """
    B, P, N = points.shape
    _, D, _ = feats.shape
    H1 = params["w1f"].shape[1]
    H2 = params["w2"].shape[1]

    if n_tile is None:
        n_tile = N if N <= 2048 else 2048
    assert N % n_tile == 0, "N must be divisible by n_tile"
    assert n_tile == N or n_tile % 128 == 0, "points tile must be lane-aligned"
    assert B % batch_tile == 0, "B must be divisible by batch_tile"
    nb, nn = B // batch_tile, N // n_tile

    # Tiny one-time casts; big activation tensors are NOT touched by the wrapper.
    w1f = params["w1f"].astype(jnp.bfloat16)
    w1p = params["w1p"].astype(jnp.bfloat16)
    w2 = params["w2"].astype(jnp.bfloat16)
    b1 = params["b1"].astype(jnp.float32)
    b2 = params["b2"].astype(jnp.float32)

    grid_spec = pltpu.PrefetchScalarGridSpec(
        num_scalar_prefetch=0,
        grid=(nb, nn),
        in_specs=[
            pl.BlockSpec((batch_tile, D, n_tile), lambda i, j: (i, 0, j)),
            pl.BlockSpec((batch_tile, P, n_tile), lambda i, j: (i, 0, j)),
            pl.BlockSpec((D, H1), lambda i, j: (0, 0)),
            pl.BlockSpec((P, H1), lambda i, j: (0, 0)),
            pl.BlockSpec((1, H1), lambda i, j: (0, 0)),
            pl.BlockSpec((H1, H2), lambda i, j: (0, 0)),
            pl.BlockSpec((1, H2), lambda i, j: (0, 0)),
        ],
        out_specs=pl.BlockSpec((batch_tile, 1, H2), lambda i, j: (i, 0, 0)),
    )

    out = pl.pallas_call(
        _gsa_kernel,
        out_shape=jax.ShapeDtypeStruct((B, 1, H2), jnp.float32),
        grid_spec=grid_spec,
        compiler_params=pltpu.CompilerParams(
            dimension_semantics=("parallel", "arbitrary")),
    )(feats, points, w1f, w1p, b1, w2, b2)

    return out.reshape(B, H2)


def make_params(key, feat_dim, pt_dim, output_dims, eps=1e-5):
    """Deterministic synthetic parameters with conv bias + eval-mode BatchNorm folded
    into the weights/bias, and layer-1 weight split into feats / points rows
    (matching torch.cat([feats, points], dim=1) channel order)."""
    assert len(output_dims) == 2
    c_in = feat_dim + pt_dim
    dims = [c_in] + list(output_dims)
    folded = []
    for c_i, c_o in zip(dims[:-1], dims[1:]):
        key, kw, kb, km, kg = jax.random.split(key, 5)
        w = jax.random.normal(kw, (c_i, c_o), jnp.float32) * 0.1
        conv_bias = jax.random.normal(kb, (c_o,), jnp.float32) * 0.05
        gamma = 1.0 + 0.1 * jax.random.normal(kg, (c_o,), jnp.float32)
        beta = jnp.zeros((c_o,), jnp.float32)
        running_mean = 0.05 * jax.random.normal(km, (c_o,), jnp.float32)
        running_var = jnp.ones((c_o,), jnp.float32)
        scale = gamma / jnp.sqrt(running_var + eps)
        shift = beta + scale * (conv_bias - running_mean)
        folded.append((w * scale[None, :], shift.reshape(1, c_o)))
    (w1, b1), (w2, b2) = folded
    return {
        "w1f": w1[:feat_dim],   # acts on feats channels
        "w1p": w1[feat_dim:],   # acts on xyz channels
        "b1": b1,
        "w2": w2,
        "b2": b2,
    }


def gsa_conv_ref(points, feats, params):
    """Pure-JAX reference mirroring the PyTorch concat formulation (and the kernel's
    bf16-operand / f32-accumulation precision choices)."""
    x = jnp.concatenate([feats, points], axis=1).astype(jnp.bfloat16)      # (B, C_in, N)
    w1 = jnp.concatenate([params["w1f"], params["w1p"]], axis=0).astype(jnp.bfloat16)
    w2 = params["w2"].astype(jnp.bfloat16)
    h = jnp.einsum("bcn,ch->bnh", x, w1, preferred_element_type=jnp.float32)
    h = jnp.maximum(h + params["b1"], 0.0)
    h = jnp.einsum("bnk,kh->bnh", h.astype(jnp.bfloat16), w2,
                   preferred_element_type=jnp.float32)
    h = jnp.maximum(h + params["b2"], 0.0)
    return jnp.max(h, axis=1)                                              # (B, H2)


if __name__ == "__main__":
    B, FEAT_DIM, PT_DIM, N = 2, 13, 3, 128
    OUTPUT_DIMS = (32, 64)

    key = jax.random.PRNGKey(0)
    key, kp, kf = jax.random.split(key, 3)
    points = jax.random.normal(kp, (B, PT_DIM, N), jnp.float32)
    feats = jax.random.normal(kf, (B, FEAT_DIM, N), jnp.float32)
    params = make_params(key, FEAT_DIM, PT_DIM, OUTPUT_DIMS)

    out = jax.block_until_ready(gsa_conv(points, feats, params))
    ref = jax.block_until_ready(gsa_conv_ref(points, feats, params))

    assert out.shape == (B, OUTPUT_DIMS[-1]), out.shape
    assert jnp.allclose(out, ref, atol=1e-3, rtol=1e-3), "mismatch vs reference"

    print("KERNEL_OK")
</pallas_src>

<mosaic_0001>
module attributes {stable_mosaic.version = 11 : i64} {
  func.func @_gsa_kernel(%arg0: i32, %arg1: i32, %arg2: memref<1x13x128xf32, #tpu.memory_space<vmem>>, %arg3: memref<1x3x128xf32, #tpu.memory_space<vmem>>, %arg4: memref<13x32xbf16, #tpu.memory_space<vmem>>, %arg5: memref<3x32xbf16, #tpu.memory_space<vmem>>, %arg6: memref<1x32xf32, #tpu.memory_space<vmem>>, %arg7: memref<32x64xbf16, #tpu.memory_space<vmem>>, %arg8: memref<1x64xf32, #tpu.memory_space<vmem>>, %arg9: memref<1x1x64xf32, #tpu.memory_space<vmem>>) attributes {dimension_semantics = [#tpu.dimension_semantics<parallel>, #tpu.dimension_semantics<arbitrary>], iteration_bounds = array<i64: 2, 1>, scalar_prefetch = 0 : i64, scratch_operands = 0 : i64, tpu.core_type = #tpu.core_type<tc>, window_params = [{transform_indices = @transform_0, window_bounds = array<i64: 1, 13, 128>}, {transform_indices = @transform_1, window_bounds = array<i64: 1, 3, 128>}, {pipeline_mode = #tpu.pipeline_mode<synchronous>, transform_indices = @transform_2, window_bounds = array<i64: 13, 32>}, {pipeline_mode = #tpu.pipeline_mode<synchronous>, transform_indices = @transform_3, window_bounds = array<i64: 3, 32>}, {pipeline_mode = #tpu.pipeline_mode<synchronous>, transform_indices = @transform_4, window_bounds = array<i64: 1, 32>}, {pipeline_mode = #tpu.pipeline_mode<synchronous>, transform_indices = @transform_5, window_bounds = array<i64: 32, 64>}, {pipeline_mode = #tpu.pipeline_mode<synchronous>, transform_indices = @transform_6, window_bounds = array<i64: 1, 64>}, {transform_indices = @transform_7, window_bounds = array<i64: 1, 1, 64>}]} {
    %c0_i32 = arith.constant 0 : i32
    %0 = arith.cmpi eq, %arg1, %c0_i32 : i32
    %c0 = arith.constant 0 : index
    %c0_0 = arith.constant 0 : index
    %c0_1 = arith.constant 0 : index
    %1 = vector.load %arg2[%c0, %c0_0, %c0_1] : memref<1x13x128xf32, #tpu.memory_space<vmem>>, vector<1x13x128xf32>
    %2 = vector.shape_cast %1 : vector<1x13x128xf32> to vector<13x128xf32>
    %3 = arith.truncf %2 : vector<13x128xf32> to vector<13x128xbf16>
    %c0_2 = arith.constant 0 : index
    %c0_3 = arith.constant 0 : index
    %c0_4 = arith.constant 0 : index
    %4 = vector.load %arg3[%c0_2, %c0_3, %c0_4] : memref<1x3x128xf32, #tpu.memory_space<vmem>>, vector<1x3x128xf32>
    %5 = vector.shape_cast %4 : vector<1x3x128xf32> to vector<3x128xf32>
    %6 = arith.truncf %5 : vector<3x128xf32> to vector<3x128xbf16>
    %c0_5 = arith.constant 0 : index
    %c0_6 = arith.constant 0 : index
    %7 = vector.load %arg4[%c0_5, %c0_6] : memref<13x32xbf16, #tpu.memory_space<vmem>>, vector<13x32xbf16>
    %cst = arith.constant dense<0.000000e+00> : vector<128x32xf32>
    %8 = tpu.matmul %3, %7, %cst {dimension_numbers = #tpu.dot_dimension_numbers<[0], [0], [1], [1], [0, 1, 1, 1], [], []>} : vector<13x128xbf16>, vector<13x32xbf16>, vector<128x32xf32> -> vector<128x32xf32>
    %c0_7 = arith.constant 0 : index
    %c0_8 = arith.constant 0 : index
    %9 = vector.load %arg5[%c0_7, %c0_8] : memref<3x32xbf16, #tpu.memory_space<vmem>>, vector<3x32xbf16>
    %cst_9 = arith.constant dense<0.000000e+00> : vector<128x32xf32>
    %10 = tpu.matmul %6, %9, %cst_9 {dimension_numbers = #tpu.dot_dimension_numbers<[0], [0], [1], [1], [0, 1, 1, 1], [], []>} : vector<3x128xbf16>, vector<3x32xbf16>, vector<128x32xf32> -> vector<128x32xf32>
    %11 = arith.addf %8, %10 : vector<128x32xf32>
    %c0_10 = arith.constant 0 : index
    %c0_11 = arith.constant 0 : index
    %12 = vector.load %arg6[%c0_10, %c0_11] : memref<1x32xf32, #tpu.memory_space<vmem>>, vector<1x32xf32>
    %13 = vector.broadcast %12 : vector<1x32xf32> to vector<128x32xf32>
    %14 = arith.addf %11, %13 : vector<128x32xf32>
    %cst_12 = arith.constant 0.000000e+00 : f32
    %15 = vector.broadcast %cst_12 : f32 to vector<128x32xf32>
    %16 = arith.maximumf %14, %15 : vector<128x32xf32>
    %17 = arith.truncf %16 : vector<128x32xf32> to vector<128x32xbf16>
    %c0_13 = arith.constant 0 : index
    %c0_14 = arith.constant 0 : index
    %18 = vector.load %arg7[%c0_13, %c0_14] : memref<32x64xbf16, #tpu.memory_space<vmem>>, vector<32x64xbf16>
    %cst_15 = arith.constant dense<0.000000e+00> : vector<128x64xf32>
    %19 = tpu.matmul %17, %18, %cst_15 {dimension_numbers = #tpu.dot_dimension_numbers<[1], [0], [0], [1], [0, 0, 1, 1], [], []>} : vector<128x32xbf16>, vector<32x64xbf16>, vector<128x64xf32> -> vector<128x64xf32>
    %c0_16 = arith.constant 0 : index
    %c0_17 = arith.constant 0 : index
    %20 = vector.load %arg8[%c0_16, %c0_17] : memref<1x64xf32, #tpu.memory_space<vmem>>, vector<1x64xf32>
    %21 = vector.broadcast %20 : vector<1x64xf32> to vector<128x64xf32>
    %22 = arith.addf %19, %21 : vector<128x64xf32>
    %cst_18 = arith.constant 0.000000e+00 : f32
    %23 = vector.broadcast %cst_18 : f32 to vector<128x64xf32>
    %24 = arith.maximumf %22, %23 : vector<128x64xf32>
    %cst_19 = arith.constant dense<0xFF800000> : vector<64xf32>
    %25 = vector.multi_reduction <maximumf>, %24, %cst_19 [0] : vector<128x64xf32> to vector<64xf32>
    %26 = vector.shape_cast %25 : vector<64xf32> to vector<1x64xf32>
    %27 = arith.extui %0 : i1 to i32
    %c0_i32_20 = arith.constant 0 : i32
    %28 = arith.cmpi ne, %27, %c0_i32_20 : i32
    scf.if %28 {
      %c0_22 = arith.constant 0 : index
      %c0_23 = arith.constant 0 : index
      %c0_24 = arith.constant 0 : index
      %32 = vector.load %arg9[%c0_22, %c0_23, %c0_24] : memref<1x1x64xf32, #tpu.memory_space<vmem>>, vector<1x1x64xf32>
      %33 = vector.shape_cast %32 : vector<1x1x64xf32> to vector<1x64xf32>
      %34 = vector.shape_cast %26 : vector<1x64xf32> to vector<1x1x64xf32>
      tpu.vector_store %arg9[%c0_22, %c0_23, %c0_24], %34 {strides = array<i32>} : memref<1x1x64xf32, #tpu.memory_space<vmem>>, vector<1x1x64xf32>,
    } else {
    }
    %true = arith.constant true
    %29 = arith.xori %0, %true : i1
    %30 = arith.extui %29 : i1 to i32
    %c0_i32_21 = arith.constant 0 : i32
    %31 = arith.cmpi ne, %30, %c0_i32_21 : i32
    scf.if %31 {
      %c0_22 = arith.constant 0 : index
      %c0_23 = arith.constant 0 : index
      %c0_24 = arith.constant 0 : index
      %32 = vector.load %arg9[%c0_22, %c0_23, %c0_24] : memref<1x1x64xf32, #tpu.memory_space<vmem>>, vector<1x1x64xf32>
      %33 = vector.shape_cast %32 : vector<1x1x64xf32> to vector<1x64xf32>
      %34 = arith.maximumf %33, %26 : vector<1x64xf32>
      %c0_25 = arith.constant 0 : index
      %c0_26 = arith.constant 0 : index
      %c0_27 = arith.constant 0 : index
      %35 = vector.load %arg9[%c0_25, %c0_26, %c0_27] : memref<1x1x64xf32, #tpu.memory_space<vmem>>, vector<1x1x64xf32>
      %36 = vector.shape_cast %35 : vector<1x1x64xf32> to vector<1x64xf32>
      %37 = vector.shape_cast %34 : vector<1x64xf32> to vector<1x1x64xf32>
      tpu.vector_store %arg9[%c0_25, %c0_26, %c0_27], %37 {strides = array<i32>} : memref<1x1x64xf32, #tpu.memory_space<vmem>>, vector<1x1x64xf32>,
    } else {
    }
    return
  }
  func.func @transform_0(%arg0: i32, %arg1: i32) -> (i32, i32, i32) {
    %c0_i32 = arith.constant 0 : i32
    %c0_i32_0 = arith.constant 0 : i32
    return %arg0, %c0_i32, %arg1 : i32, i32, i32
  }
  func.func @transform_1(%arg0: i32, %arg1: i32) -> (i32, i32, i32) {
    %c0_i32 = arith.constant 0 : i32
    %c0_i32_0 = arith.constant 0 : i32
    return %arg0, %c0_i32, %arg1 : i32, i32, i32
  }
  func.func @transform_2(%arg0: i32, %arg1: i32) -> (i32, i32) {
    %c0_i32 = arith.constant 0 : i32
    %c0_i32_0 = arith.constant 0 : i32
    %c0_i32_1 = arith.constant 0 : i32
    return %c0_i32, %c0_i32_0 : i32, i32
  }
  func.func @transform_3(%arg0: i32, %arg1: i32) -> (i32, i32) {
    %c0_i32 = arith.constant 0 : i32
    %c0_i32_0 = arith.constant 0 : i32
    %c0_i32_1 = arith.constant 0 : i32
    return %c0_i32, %c0_i32_0 : i32, i32
  }
  func.func @transform_4(%arg0: i32, %arg1: i32) -> (i32, i32) {
    %c0_i32 = arith.constant 0 : i32
    %c0_i32_0 = arith.constant 0 : i32
    %c0_i32_1 = arith.constant 0 : i32
    return %c0_i32, %c0_i32_0 : i32, i32
  }
  func.func @transform_5(%arg0: i32, %arg1: i32) -> (i32, i32) {
    %c0_i32 = arith.constant 0 : i32
    %c0_i32_0 = arith.constant 0 : i32
    %c0_i32_1 = arith.constant 0 : i32
    return %c0_i32, %c0_i32_0 : i32, i32
  }
  func.func @transform_6(%arg0: i32, %arg1: i32) -> (i32, i32) {
    %c0_i32 = arith.constant 0 : i32
    %c0_i32_0 = arith.constant 0 : i32
    %c0_i32_1 = arith.constant 0 : i32
    return %c0_i32, %c0_i32_0 : i32, i32
  }
  func.func @transform_7(%arg0: i32, %arg1: i32) -> (i32, i32, i32) {
    %c0_i32 = arith.constant 0 : i32
    %c0_i32_0 = arith.constant 0 : i32
    %c0_i32_1 = arith.constant 0 : i32
    return %arg0, %c0_i32, %c0_i32_0 : i32, i32, i32
  }
}

</mosaic_0001>

<bundles_post_ra>
// kernel: tpu_custom_call.1
= control target key start
LH: loop header
LB: loop body
LE: loop exit
PB: predicated region body
PF: predicated region fallthrough
CT: control target
= control target key end

     0   :  { %12 = vsyncpa [#allocation3], 0  ;;  %s1485_s0 = inlined_call_operand.vmem [shape: f32[2,13,128], index: 0, kind: input, shape index: {}]   ;;  %s1486_s1 = inlined_call_operand.vmem [shape: f32[2,3,128], index: 1, kind: input, shape index: {}]   ;;  %s1487_s2 = inlined_call_operand.vmem [shape: bf16[13,32], index: 2, kind: input, shape index: {}]   ;;  %s1488_s3 = inlined_call_operand.vmem [shape: bf16[3,32], index: 3, kind: input, shape index: {}]   ;;  %s1489_s4 = inlined_call_operand.vmem [shape: f32[1,32], index: 4, kind: input, shape index: {}]   ;;  %s1490_s5 = inlined_call_operand.vmem [shape: bf16[32,64], index: 5, kind: input, shape index: {}]   ;;  %s1491_s6 = inlined_call_operand.vmem [shape: f32[1,64], index: 6, kind: input, shape index: {}]   ;;  %s1492_s7 = inlined_call_operand.hbm [shape: f32[2,1,64], index: 7, kind: output, shape index: {}]  }
   0x1   :  { %14 = vsyncpa [#allocation3 + $0x1], 0  ;;  %s1295_s24 = smov 0   ;;  %s1297_s25 = smov 0  }
   0x2   :  { %s1299_s26 = smov 0   ;;  %s1301_s27 = smov 0  }
   0x3   :  { %s1303_s28 = smov 0   ;;  %s1305_s29 = smov 0  }
   0x4 LB: > { %s988_s30 = sadd.s32 4294967295, %s1251_s29   ;;  %s989_s8 = sadd.s32 4294967294, %s1251_s29   ;;  %s1251_s29 = sphi %s1305_s29, %s20_s29   ;;  %s1247_s28 = sphi %s1303_s28, %s1499_s28   ;;  %s1243_s27 = sphi %s1301_s27, %s1498_s27   ;;  %s1239_s26 = sphi %s1299_s26, %s1497_s26   ;;  %s1235_s25 = sphi %s1297_s25, %s1496_s25   ;;  %s1231_s24 = sphi %s1295_s24, %s1495_s24  }
   0x5   : > { %s32_s9 = sadd.s32 1, %s1247_s28  ;;  %s200_s10 = sadd.s32 1, %s1239_s26 }
   0x6   : > { %p34_p0 = scmp.ge.s32.totalorder %s32_s9, 2  ;;  %p210_p1 = scmp.ne.s32.totalorder %s1239_s26, %s1235_s25 }
   0x7   : > { %p211_p2 = scmp.eq.s32.totalorder %s988_s30, 1  ;;  %p216_p3 = scmp.ne.s32.totalorder %s1235_s25, %s1231_s24 }
   0x8   : > { %s1501_s9 = smov (%p34_p0, %s32_s9), 0  ;;  %p217_p5 = scmp.eq.s32.totalorder %s989_s8, 1 }
   0x9   : > { %p1335_p4 = por %p211_p2, %p210_p1  ;;  %s197_s12 = ssub.s32 %s1247_s28, %s1501_s9 }
   0xa   : > { %p992_p6 = scmp.ge.s32.totalorder %s1251_s29, 1  ;;  %p198_p7 = scmp.eq.s32.totalorder %s197_s12, 0 }
   0xb   : > { %p1342_p8 = por %p217_p5, %p216_p3  ;;  %p271_p9 = scmp.lt.s32.totalorder %s1251_s29, 3 }
   0xc   : > { %s1348_s14 = scalar_select %p198_p7, %s1239_s26, %s200_s10  }
   0xd   : > { %p272_p10 = pnand %p992_p6, %p271_p9 }
   0xe   : > { %p312_p11 = scmp.lt.s32.totalorder (!%p272_p10), %s1243_s27, 1  ;;  %s1254_s19 = smov (!%p272_p10), [#allocation2]  }
   0xf   : > { %275 = sbr.rel (%p272_p10) target bundleno = 629 (0x275), region = 48 }
  0x14   : > { %v336_v0 = vld [vmem:[%s1488_s3] sm:$0x3]  ;;  %vm378_vm0 = vcmask 1040384   ;;  %vm379_vm1 = vcmask 1041408   ;;  %s313_s17 = scalar_select %p312_p11, %s1243_s27, 1  ;;  %v1253_v1 = vmov 65535  }
  0x15   : > { %v380_v2 = vsel %vm378_vm0, 4294967295, %v1253_v1  ;;  %v1172_v3 = vld [vmem:[%s1487_s2] sm:$0x7f]   ;;  %vm528_vm2 = vcmask 1045504   ;;  %vm529_vm3 = vcmask 1046528   ;;  %vm353_vm4 = vcmask 23552  }
  0x16   : > { %v381_v4 = vsel %vm379_vm1, %v380_v2, 0  ;;  %v530_v5 = vsel %vm528_vm2, 4294967295, %v1253_v1  ;;  %s995_s20 = sshll.u32 %s313_s17, 2  ;;  %s1028_s30 = sshll.u32 %s313_s17, 4  ;;  %vm503_vm5 = vcmask 105472   ;;  %v1173_v30 = vld [vmem:[%s1490_s5 + $0x8] sm:$0xff]  }
  0x17   : > { %v383_v6 = vand.u32 %v381_v4, %v336_v0  ;;  %v531_v7 = vsel %vm529_vm3, %v530_v5, 0  ;;  %s326_s23 = scalar_lea.vmem %s1486_s1, %s995_s20  ;;  %s319_s12 = scalar_lea.vmem %s1485_s0, %s1028_s30  ;;  %v1174_v31 = vld [vmem:[%s1490_s5] sm:$0xff]   ;;  %vm702_vm6 = vcmask 261120   ;;  %vm840_vm7 = vcmask 523264  }
  0x18   : > { %v533_v8 = vand.u32 %v1172_v3, %v531_v7  ;;  %v332_v9 = vld [vmem:[%s326_s23] sm:$0x7]  ;;  %v330_v12 = vld [vmem:[%s319_s12 + $0x8] sm:$0x1f]  ;;  %s310_s23 = sand.u32 1, %s1235_s25   ;;  %s1025_s30 = sshll.u32 %s1243_s27, 4 }
  0x19   : > { %1057 = vmatprep.subr.bf16.mxu0 %v383_v6  ;;  %1113 = vmatprep.subr.bf16.mxu1 %v383_v6  ;;  %v333_v10 = vpack.c.bf16 %v332_v9, %v332_v9  ;;  %v329_v11 = vld [vmem:[%s319_s12] sm:$0xff]  ;;  %s311_s8 = scalar_lea.vmem [#allocation2], %s310_s23  ;;  %vm881_vm8 = vcmask 516096   ;;  %s902_s16 = scalar_lea.hbm %s1492_s7, %s1025_s30 }
  0x1a   : > { %1058 = vmatpush3.bf16.msra.mxu0 %v383_v6  ;;  %1114 = vmatpush3.bf16.msra.mxu1 %v383_v6  ;;  %v331_v13 = vpack.c.bf16 %v330_v12, %v329_v11  ;;  %v1397_v50 = vld [vmem:[%s1489_s4] ss:$0 sm:$0xff]  ;;  %s904_s10 = sshll.u32 %s311_s8, 4  ;;  %s892_s17 = scalar_lea.sflag [#allocation3], %s310_s23  ;;  %s905_s10 = int_to_ptr.vmem [resolvable:$true] %s904_s10 }
  0x1b   : > { %1075 = vmatprep.subr.bf16.mxu1 %v533_v8  ;;  %337 = vxpose.xlu0.c.b16.start.end [1/1] (short) %v333_v10, 128  ;;  %s1175_s18 = scalar_lea.vmem %s905_s10, 16  ;;  %s1179_s20 = sshll.u32 %s1254_s19, 4  ;;  %s1180_s20 = int_to_ptr.vmem [resolvable:$false] %s1179_s20 }
  0x1c   : > { %1093 = vmatprep.subr.bf16.mxu0 %v1173_v30  ;;  %p1176_p12 = scmp.ne.s32.totalorder %s905_s10, %s1175_s18  ;;  %s1181_s27 = scalar_lea.vmem %s1180_s20, 32 }
  0x1d   : > { %p1182_p1 = scmp.lt.s32.totalorder %s905_s10, %s1180_s20  ;;  %p1183_p2 = scmp.lt.s32.totalorder %s1181_s27, %s1175_s18 }
  0x1e   : > { %p1177_p13 = pnand %p1176_p12, %p1335_p4 }
  0x1f   : > { %p1184_p3 = por %p1183_p2, %p1182_p1 }
  0x20   : > { %p1178_p0 = pneg %p1177_p13 }
  0x22   : > { %p1185_p5 = pnand %p1184_p3, %p1178_p0 }
  0x38   : > { %482 = vxpose.xlu0.c.b16.start.end [1/1] (short) %v331_v13, 128 }
  0x7d   : > { %v345_v14 = vpop.trf.xlu0 }
  0x7e   : > { %1059 = vmatprep.mubr.msk.bf16.mxu0 %vm353_vm4, %v345_v14 }
  0x81   : > { %v346_v15 = vpop.trf.xlu0 }
  0x82   : > { %1060 = vmatmul.mubr.msk.bf16.vlgmr.msra.gmra.mxu0 %vm353_vm4, %v346_v15 }
  0x83   : > { %1094 = vmatpush3.bf16.msra.mxu0 %v1173_v30 }
  0x84   : > { %1095 = vmatprep.subr.bf16.mxu0 %v1174_v31 }
  0x85   : > { %v347_v16 = vpop.trf.xlu0 }
  0x86   : > { %1063 = vmatprep.mubr.msk.bf16.mxu0 %vm353_vm4, %v347_v16 }
  0x87   : > { %1096 = vmatpush3.bf16.msra.mxu0 %v1174_v31 }
  0x89   : > { %v348_v17 = vpop.trf.xlu0 }
  0x8a   : > { %1064 = vmatmul.mubr.msk.bf16.gmra.mxu0 %vm353_vm4, %v348_v17 }
  0x8d   : > { %v349_v18 = vpop.trf.xlu0 }
  0x8e   : > { %1067 = vmatprep.mubr.msk.bf16.mxu1 %vm353_vm4, %v349_v18 }
  0x91   : > { %v350_v19 = vpop.trf.xlu0 }
  0x92   : > { %1068 = vmatmul.mubr.msk.bf16.vlgmr.msra.gmra.mxu1 %vm353_vm4, %v350_v19 }
  0x93   : > { %1076 = vmatpush3.bf16.msra.mxu1 %v533_v8 }
  0x95   : > { %v351_v20 = vpop.trf.xlu0 }
  0x96   : > { %1071 = vmatprep.mubr.msk.bf16.mxu1 %vm353_vm4, %v351_v20 }
  0x99   : > { %v352_v21 = vpop.trf.xlu0 }
  0x9a   : > { %1072 = vmatmul.mubr.msk.bf16.gmra.mxu1 %vm353_vm4, %v352_v21 }
  0x9d   : > { %v490_v22 = vpop.trf.xlu0 }
  0x9e   : > { %1077 = vmatprep.mubr.msk.bf16.mxu1 %vm503_vm5, %v490_v22 }
  0xa1   : > { %v491_v23 = vpop.trf.xlu0 }
  0xa2   : > { %1078 = vmatmul.mubr.msk.bf16.vlgmr.msra.gmra.mxu1 %vm503_vm5, %v491_v23 }
  0xa5   : > { %v492_v24 = vpop.trf.xlu0 }
  0xa6   : > { %1081 = vmatprep.mubr.msk.bf16.mxu1 %vm503_vm5, %v492_v24 }
  0xa9   : > { %v493_v25 = vpop.trf.xlu0 }
  0xaa   : > { %1082 = vmatmul.mubr.msk.bf16.gmra.mxu1 %vm503_vm5, %v493_v25 }
  0xad   : > { %v494_v26 = vpop.trf.xlu0 }
  0xae   : > { %1085 = vmatprep.mubr.msk.bf16.mxu1 %vm503_vm5, %v494_v26 }
  0xb1   : > { %v495_v27 = vpop.trf.xlu0 }
  0xb2   : > { %1086 = vmatmul.mubr.msk.bf16.gmra.mxu1 %vm503_vm5, %v495_v27 }
  0xb5   : > { %v496_v28 = vpop.trf.xlu0 }
  0xb6   : > { %1089 = vmatprep.mubr.msk.bf16.mxu1 %vm503_vm5, %v496_v28 }
  0xb9   : > { %v497_v29 = vpop.trf.xlu0 }
  0xba   : > { %1090 = vmatmul.mubr.msk.bf16.gmra.mxu1 %vm503_vm5, %v497_v29 }
 0x142   : > { %v1061_v33 = vpop.f32.mrf.mxu0 }
 0x144   : > { %v419_v36 = vpop.f32.mrf.mxu0 }
 0x146   : > { %v1062_v39 = vpop.f32.mrf.mxu0 }
 0x148   : > { %v422_v42 = vpop.f32.mrf.mxu0 }
 0x14a   : > { %v1065_v45 = vpop.f32.mrf.mxu0 }
 0x14c   : > { %v435_v52 = vpop.f32.mrf.mxu0 }
 0x14e   : > { %v1066_v60 = vpop.f32.mrf.mxu0 }
 0x150   : > { %v438_v7 = vpop.f32.mrf.mxu0 }
 0x152   : > { %v1069_v32 = vpop.f32.mrf.mxu1 }
 0x154   : > { %v451_v34 = vpop.f32.mrf.mxu1 }
 0x156   : > { %v1070_v35 = vpop.f32.mrf.mxu1 }
 0x158   : > { %v454_v37 = vpop.f32.mrf.mxu1 }
 0x15a   : > { %v1386_v38 = vpop.f32.mrf.mxu1 }
 0x15c   : > { %v1388_v40 = vpop.f32.mrf.mxu1 }
 0x15e   : > { %v1390_v41 = vpop.f32.mrf.mxu1 }
 0x160   : > { %v1392_v43 = vpop.f32.mrf.mxu1 }
 0x162   : > { %v1079_v44 = vpop.f32.mrf.mxu1 }
 0x163   : > { %v578_v48 = vadd.f32 %v1079_v44, %v1061_v33 }
 0x164   : > { %v569_v46 = vpop.f32.mrf.mxu1 }
 0x165   : > { %v570_v47 = vadd.f32 %v569_v46, %v419_v36  ;;  %v641_v57 = vadd.f32 %v1397_v50, %v578_v48 }
 0x166   : > { %v1080_v49 = vpop.f32.mrf.mxu1 }
 0x167   : > { %v581_v51 = vadd.f32 %v1080_v49, %v1062_v39  ;;  %v639_v54 = vadd.f32 %v1397_v50, %v570_v47  ;;  %v657_v2 = vmax.f32 %v641_v57, 0.0 }
 0x168   : > { %v572_v53 = vpop.f32.mrf.mxu1 }
 0x169   : > { %v642_v55 = vadd.f32 %v1397_v50, %v581_v51  ;;  %v573_v56 = vadd.f32 %v572_v53, %v422_v42  ;;  %v655_v63 = vmax.f32 %v639_v54, 0.0 }
 0x16a   : > { %v1083_v58 = vpop.f32.mrf.mxu1 }
 0x16b   : > { %v640_v59 = vadd.f32 %v1397_v50, %v573_v56  ;;  %v658_v61 = vmax.f32 %v642_v55, 0.0  ;;  %v594_v3 = vadd.f32 %v1083_v58, %v1065_v45 }
 0x16c   : > { %v585_v62 = vpop.f32.mrf.mxu1 }
 0x16d   : > { %v656_v0 = vmax.f32 %v640_v59, 0.0  ;;  %v586_v1 = vadd.f32 %v585_v62, %v435_v52  ;;  %v672_v8 = vpack.c.bf16 %v658_v61, %v657_v2  ;;  %v645_v13 = vadd.f32 %v1397_v50, %v594_v3 }
 0x16e   : > { %v1084_v4 = vpop.f32.mrf.mxu1 }
 0x16f   : > { %v671_v5 = vpack.c.bf16 %v656_v0, %v655_v63  ;;  %v597_v6 = vadd.f32 %v1084_v4, %v1066_v60  ;;  %v643_v10 = vadd.f32 %v1397_v50, %v586_v1  ;;  %v661_v21 = vmax.f32 %v645_v13, 0.0 }
 0x170   : > { %v588_v9 = vpop.f32.mrf.mxu1 }
 0x171   : > { %v646_v11 = vadd.f32 %v1397_v50, %v597_v6  ;;  %v589_v12 = vadd.f32 %v588_v9, %v438_v7  ;;  %1097 = vmatprep.mubr.msk.bf16.mxu0 %vm702_vm6, %v671_v5  ;;  %v659_v18 = vmax.f32 %v643_v10, 0.0 }
 0x172   : > { %v1087_v14 = vpop.f32.mrf.mxu1  ;;  %1098 = vmatmul.mubr.msk.bf16.vlgmr.msra.gmra.mxu0 %vm702_vm6, %v672_v8 }
 0x173   : > { %v644_v15 = vadd.f32 %v1397_v50, %v589_v12  ;;  %v662_v16 = vmax.f32 %v646_v11, 0.0  ;;  %v610_v22 = vadd.f32 %v1087_v14, %v1069_v32 }
 0x174   : > { %v601_v17 = vpop.f32.mrf.mxu1 }
 0x175   : > { %v660_v19 = vmax.f32 %v644_v15, 0.0  ;;  %v602_v20 = vadd.f32 %v601_v17, %v451_v34  ;;  %v674_v26 = vpack.c.bf16 %v662_v16, %v661_v21  ;;  %v649_v31 = vadd.f32 %v1397_v50, %v610_v22 }
 0x176   : > { %v1088_v23 = vpop.f32.mrf.mxu1 }
 0x177   : > { %v673_v24 = vpack.c.bf16 %v660_v19, %v659_v18  ;;  %v613_v25 = vadd.f32 %v1088_v23, %v1070_v35  ;;  %v647_v28 = vadd.f32 %v1397_v50, %v602_v20  ;;  %v665_v44 = vmax.f32 %v649_v31, 0.0 }
 0x178   : > { %v604_v27 = vpop.f32.mrf.mxu1 }
 0x179   : > { %v650_v29 = vadd.f32 %v1397_v50, %v613_v25  ;;  %v605_v30 = vadd.f32 %v604_v27, %v454_v37  ;;  %1101 = vmatprep.mubr.msk.bf16.mxu0 %vm702_vm6, %v673_v24  ;;  %v663_v39 = vmax.f32 %v647_v28, 0.0 }
 0x17a   : > { %v1091_v33 = vpop.f32.mrf.mxu1  ;;  %1102 = vmatmul.mubr.msk.bf16.gmra.mxu0 %vm702_vm6, %v674_v26 }
 0x17b   : > { %v648_v34 = vadd.f32 %v1397_v50, %v605_v30  ;;  %v666_v32 = vmax.f32 %v650_v29, 0.0  ;;  %v626_v45 = vadd.f32 %v1091_v33, %v1386_v38 }
 0x17c   : > { %v617_v36 = vpop.f32.mrf.mxu1 }
 0x17d   : > { %v664_v35 = vmax.f32 %v648_v34, 0.0  ;;  %v618_v42 = vadd.f32 %v617_v36, %v1388_v40  ;;  %v676_v48 = vpack.c.bf16 %v666_v32, %v665_v44  ;;  %v653_v54 = vadd.f32 %v1397_v50, %v626_v45 }
 0x17e   : > { %v1092_v46 = vpop.f32.mrf.mxu1 }
 0x17f   : > { %v675_v37 = vpack.c.bf16 %v664_v35, %v663_v39  ;;  %v629_v47 = vadd.f32 %v1092_v46, %v1390_v41  ;;  %v651_v51 = vadd.f32 %v1397_v50, %v618_v42  ;;  %v669_v41 = vmax.f32 %v653_v54, 0.0 }
 0x180   : > { %v620_v49 = vpop.f32.mrf.mxu1 }
 0x181   : > { %v654_v52 = vadd.f32 %v1397_v50, %v629_v47  ;;  %v621_v53 = vadd.f32 %v620_v49, %v1392_v43  ;;  %1105 = vmatprep.mubr.msk.bf16.mxu0 %vm702_vm6, %v675_v37  ;;  %v667_v55 = vmax.f32 %v651_v51, 0.0 }
 0x182   : > { %1106 = vmatmul.mubr.msk.bf16.gmra.mxu0 %vm702_vm6, %v676_v48 }
 0x183   : > { %v652_v38 = vadd.f32 %v1397_v50, %v621_v53  ;;  %v670_v40 = vmax.f32 %v654_v52, 0.0  ;;  %v1014_v50 = vld [vmem:[%s1491_s6] ss:$0 sm:$0xff] }
 0x185   : > { %v668_v56 = vmax.f32 %v652_v38, 0.0  ;;  %v678_v58 = vpack.c.bf16 %v670_v40, %v669_v41 }
 0x187   : > { %v677_v57 = vpack.c.bf16 %v668_v56, %v667_v55 }
 0x189   : > { %1109 = vmatprep.mubr.msk.bf16.mxu0 %vm702_vm6, %v677_v57 }
 0x18a   : > { %1110 = vmatmul.mubr.msk.bf16.gmra.mxu0 %vm702_vm6, %v678_v58 }
 0x232   : > { %v1099_v59 = vpop.f32.mrf.mxu0 }
 0x233   : > { %v770_v3 = vadd.f32 %v1099_v59, %v1014_v50 }
 0x234   : > { %v761_v43 = vpop.f32.mrf.mxu0 }
 0x235   : > { %v826_v12 = vmax.f32 %v770_v3, 0.0  ;;  %v762_v13 = vadd.f32 %v1014_v50, %v761_v43 }
 0x236   : > { %v1100_v60 = vpop.f32.mrf.mxu0 }
 0x237   : > { %v773_v6 = vadd.f32 %v1100_v60, %v1014_v50  ;;  %v843_v27 = vsel %vm840_vm7, %v826_v12, -inf  ;;  %v824_v28 = vmax.f32 %v762_v13, 0.0 }
 0x238   : > { %v764_v61 = vpop.f32.mrf.mxu0 }
 0x239   : > { %v765_v14 = vadd.f32 %v1014_v50, %v764_v61  ;;  %v827_v20 = vmax.f32 %v773_v6, 0.0  ;;  %v841_v49 = vsel %vm840_vm7, %v824_v28, -inf }
 0x23a   : > { %v1103_v62 = vpop.f32.mrf.mxu0 }
 0x23b   : > { %v786_v7 = vadd.f32 %v1103_v62, %v1014_v50  ;;  %v825_v29 = vmax.f32 %v765_v14, 0.0  ;;  %v844_v39 = vsel %vm840_vm7, %v827_v20, -inf }
 0x23c   : > { %v777_v63 = vpop.f32.mrf.mxu0 }
 0x23d   : > { %v778_v8 = vadd.f32 %v1014_v50, %v777_v63  ;;  %v830_v21 = vmax.f32 %v786_v7, 0.0  ;;  %v842_v51 = vsel %vm840_vm7, %v825_v29, -inf }
 0x23e   : > { %v1104_v0 = vpop.f32.mrf.mxu0 }
 0x23f   : > { %v789_v5 = vadd.f32 %v1104_v0, %v1014_v50  ;;  %v828_v22 = vmax.f32 %v778_v8, 0.0  ;;  %v849_v35 = vsel %vm840_vm7, %v830_v21, -inf }
 0x240   : > { %v780_v1 = vpop.f32.mrf.mxu0  ;;  %v850_v41 = vmax.f32 %v843_v27, %v849_v35 }
 0x241   : > { %v781_v9 = vadd.f32 %v1014_v50, %v780_v1  ;;  %v831_v17 = vmax.f32 %v789_v5, 0.0  ;;  %v845_v42 = vsel %vm840_vm7, %v828_v22, -inf }
 0x242   : > { %v1107_v2 = vpop.f32.mrf.mxu0  ;;  %v846_v57 = vmax.f32 %v841_v49, %v845_v42 }
 0x243   : > { %v802_v15 = vadd.f32 %v1107_v2, %v1014_v50  ;;  %v829_v23 = vmax.f32 %v781_v9, 0.0  ;;  %v851_v33 = vsel %vm840_vm7, %v831_v17, -inf }
 0x244   : > { %v793_v4 = vpop.f32.mrf.mxu0  ;;  %v852_v52 = vmax.f32 %v844_v39, %v851_v33 }
 0x245   : > { %v794_v18 = vadd.f32 %v1014_v50, %v793_v4  ;;  %v834_v30 = vmax.f32 %v802_v15, 0.0  ;;  %v847_v44 = vsel %vm840_vm7, %v829_v23, -inf }
 0x246   : > { %v1108_v10 = vpop.f32.mrf.mxu0  ;;  %v848_v58 = vmax.f32 %v842_v51, %v847_v44 }
 0x247   : > { %v805_v11 = vadd.f32 %v1108_v10, %v1014_v50  ;;  %v832_v34 = vmax.f32 %v794_v18, 0.0  ;;  %v857_v53 = vsel %vm840_vm7, %v834_v30, -inf }
 0x248   : > { %v796_v16 = vpop.f32.mrf.mxu0  ;;  %v858_v63 = vmax.f32 %v850_v41, %v857_v53 }
 0x249   : > { %v797_v19 = vadd.f32 %v1014_v50, %v796_v16  ;;  %v835_v25 = vmax.f32 %v805_v11, 0.0  ;;  %v853_v38 = vsel %vm840_vm7, %v832_v34, -inf }
 0x24a   : > { %v1111_v24 = vpop.f32.mrf.mxu0  ;;  %v854_v0 = vmax.f32 %v846_v57, %v853_v38 }
 0x24b   : > { %v818_v26 = vadd.f32 %v1111_v24, %v1014_v50  ;;  %v833_v32 = vmax.f32 %v797_v19, 0.0  ;;  %v859_v46 = vsel %vm840_vm7, %v835_v25, -inf }
 0x24c   : > { %v809_v31 = vpop.f32.mrf.mxu0  ;;  %v860_v59 = vmax.f32 %v852_v52, %v859_v46 }
 0x24d   : > { %v810_v36 = vadd.f32 %v1014_v50, %v809_v31  ;;  %v838_v37 = vmax.f32 %v818_v26, 0.0  ;;  %v855_v40 = vsel %vm840_vm7, %v833_v32, -inf }
 0x24e   : > { %v1112_v45 = vpop.f32.mrf.mxu0  ;;  %v856_v1 = vmax.f32 %v848_v58, %v855_v40 }
 0x24f   : > { %v836_v47 = vmax.f32 %v810_v36, 0.0  ;;  %v821_v48 = vadd.f32 %v1112_v45, %v1014_v50  ;;  %v865_v43 = vsel %vm840_vm7, %v838_v37, -inf }
 0x250   : > { %v812_v54 = vpop.f32.mrf.mxu0 }
 0x251   : > { %v839_v55 = vmax.f32 %v821_v48, 0.0  ;;  %v813_v56 = vadd.f32 %v1014_v50, %v812_v54  ;;  %v861_v60 = vsel %vm840_vm7, %v836_v47, -inf  ;;  %v866_v50 = vmax.f32 %v858_v63, %v865_v43 }
 0x252   : > { %v862_v4 = vmax.f32 %v854_v0, %v861_v60 }
 0x253   : > { %v867_v61 = vsel %vm840_vm7, %v839_v55, -inf  ;;  %v837_v62 = vmax.f32 %v813_v56, 0.0 }
 0x254   : > { %v868_v2 = vmax.f32 %v860_v59, %v867_v61 }
 0x255   : > { %v863_v3 = vsel %vm840_vm7, %v837_v62, -inf }
 0x256   : > { %v864_v5 = vmax.f32 %v856_v1, %v863_v3  ;;  %v870_v6 = vmax.f32 %v866_v50, %v868_v2 }
 0x258   : > { %v869_v7 = vmax.f32 %v862_v4, %v864_v5 }
 0x25a   : > { %v871_v8 = vmax.f32 %v869_v7, %v870_v6 }
 0x25c   : > { %v872_v9 = vrot.slane %v871_v8, 4 }
 0x25e   : > { %v873_v10 = vmax.f32 %v871_v8, %v872_v9 }
 0x260   : > { %v874_v11 = vrot.slane %v873_v10, 2 }
 0x262   : > { %v875_v12 = vmax.f32 %v873_v10, %v874_v11 }
 0x264   : > { %v876_v13 = vrot.slane %v875_v12, 1 }
 0x266   : > { %v877_v14 = vmax.f32 %v875_v12, %v876_v13 }
 0x268   : > { %882 = vst.msk [vmem:[%s311_s8] sm:$0x1] %vm881_vm8, %v877_v14 }
 0x269   : > { %1188 = shalt.err (!%p1185_p5)
}
 0x26a   : > { %s1189_s21 = scalar_lea.hbm %s902_s16, 16  ;;  %s1193_s30 = scalar_lea.hbm %s1492_s7, 32 }
 0x26b   : > { %p1190_p6 = scmp.ne.s32.totalorder %s902_s16, %s1189_s21  ;;  %p1194_p10 = scmp.lt.s32.totalorder %s902_s16, %s1492_s7 }
 0x26c   : > { %p1195_p11 = scmp.lt.s32.totalorder %s1193_s30, %s1189_s21 }
 0x26d   : > { %p1191_p7 = pnand %p1190_p6, %p1335_p4 }
 0x26e   : > { %p1196_p12 = por %p1195_p11, %p1194_p10 }
 0x26f   : > { %p1192_p9 = pneg %p1191_p7 }
 0x271   : > { %p1197_p13 = pnand %p1196_p12, %p1192_p9 }
 0x273   : > { %1200 = shalt.err (!%p1197_p13)
}
 0x274   : > { %1115 = dma.vmem_to_hbm [thread:$0]  (%p1335_p4), %s905_s10, 16, %s902_s16, %s892_s17  }
 0x275 PF: > { %p1121_p0 = scmp.ge.s32.totalorder %s1251_s29, 2  ;;  %s916_s15 = sand.u32 1, %s1231_s24  }
 0x276   : > { %s917_s18 = scalar_lea.sflag [#allocation3], %s916_s15 }
 0x277   : > { %p1118_p1 = pnand %p1121_p0, %p1342_p8 }
 0x279   : > { %p1119_p2 = pneg %p1118_p1 }
 0x27b   : > { %1226 = dma.done.wait (%p1119_p2), %s917_s18, 16  }
 0x27c   : > { %1228 = vsyncadd (%p1119_p2), %s917_s18, 4294967280  ;;  %s20_s29 = sadd.s32 1, %s1251_s29   ;;  %s1495_s24 = smov %s1235_s25 }
 0x27d   : > { %p17_p3 = scmp.ge.s32.totalorder %s20_s29, 4   ;;  %s1496_s25 = smov %s1239_s26 }
 0x27e   : > { %s1497_s26 = smov %s1348_s14  ;;  %s1498_s27 = smov %s1247_s28 }
 0x27f   : > { %s1499_s28 = smov %s1501_s9  ;;  %19 = sbr.rel (!%p17_p3) target bundleno = 4 (0x4), region = 94 }
 0x284   :  { %921 = vsyncpa [#allocation3], 1 }
 0x285   :  { %923 = vsyncpa [#allocation3 + $0x1], 1 }

</bundles_post_ra>
